<compile_context>
chip_gen: v7x
topology: tpu7x:2x2x1
jax: 0.10.0
libtpu: 0.0.40
codegen_flags: <defaults>
</compile_context>

<pallas_src>
import functools

import jax
import jax.numpy as jnp
from jax.experimental import pallas as pl
from jax.experimental.pallas import tpu as pltpu


# --------------------------------------------------------------------------- kernel
def _transition_block3_kernel(x_ref, sb_ref, wt_ref, o_ref):
    # x_ref:  (1, Cin, T)  tile of the (N, Cin, H*W) input (lane dim = spatial)
    # sb_ref: (Cin, 2)     col 0 = folded BN scale, col 1 = folded BN bias (f32)
    # wt_ref: (Cout, Cin)  transposed 1x1 deconv weight, already in matmul dtype
    # o_ref:  (1, Cout, T)
    x = x_ref[0].astype(jnp.float32)                 # (Cin, T), BN/ReLU math in f32
    scale = sb_ref[:, 0:1]                           # (Cin, 1) -> broadcast over lanes
    bias = sb_ref[:, 1:2]                            # (Cin, 1)
    w = wt_ref[...]                                  # (Cout, Cin), no per-step cast
    y = jnp.maximum(x * scale + bias, 0.0).astype(w.dtype)   # fused cast epilogue
    o_ref[0] = jnp.dot(w, y, preferred_element_type=jnp.float32).astype(o_ref.dtype)


# --------------------------------------------------------------------------- helpers
def _round_up(v, m):
    return -(-v // m) * m


def _pick_hw_tile(hw, cin, cout, x_itemsize, out_itemsize, mm_itemsize,
                  budget_bytes, max_tile=8192):
    """Largest multiple-of-128 spatial tile fitting a VMEM budget.

    Counts double-buffered input/output tiles plus the single-buffered in-kernel
    intermediates (f32 upcast + matmul-dtype activation)."""
    per_col = (2 * (cin * x_itemsize + cout * out_itemsize)
               + cin * (4 + mm_itemsize))
    t = (budget_bytes // max(per_col, 1)) // 128 * 128
    t = max(128, min(t, max_tile))
    return hw if hw <= t else t                       # full-HW block is always legal


def _even_spatial_split(hw, t_hw):
    """Nudge the spatial tile so the number of spatial tiles is even (v7x 2-TC split)."""
    n_tiles = -(-hw // t_hw)
    if n_tiles % 2 == 0:
        return t_hw
    target = n_tiles + 1
    t_new = _round_up(-(-hw // target), 128)
    if 128 <= t_new < hw and (-(-hw // t_new)) % 2 == 0:
        return t_new
    return t_hw


# --------------------------------------------------------------------------- pallas_call wrapper
def _fused_bn_relu_conv1x1(x3, sb, wt, out_dtype, hw_tile=None):
    """x3: (N, Cin, HW); sb: (Cin, 2) f32; wt: (Cout, Cin) in matmul dtype."""
    N, Cin, HW = x3.shape
    Cout = wt.shape[0]
    x_itemsize = jnp.dtype(x3.dtype).itemsize
    out_itemsize = jnp.dtype(out_dtype).itemsize
    mm_itemsize = jnp.dtype(wt.dtype).itemsize

    # Per-chip VMEM capacity (v7x: 64 MiB/TC; v5e/v6e: 128 MiB). Conservative fallback.
    try:
        vmem_cap = int(pltpu.get_tpu_info().vmem_capacity_bytes)
    except Exception:
        vmem_cap = 64 << 20

    # Bigger tiles on 128-MiB parts; stay well clear of the cap on v7x.
    budget = max(24 << 20, min(vmem_cap // 2, 56 << 20))

    if hw_tile is None:
        t_hw = _pick_hw_tile(HW, Cin, Cout, x_itemsize, out_itemsize, mm_itemsize, budget)
        if N % 2 == 1:                       # odd batch: balance the 2 TCs on v7x
            t_hw = _even_spatial_split(HW, t_hw)
    else:
        t_hw = HW if HW <= hw_tile else max(128, (hw_tile // 128) * 128)

    grid = (N, pl.cdiv(HW, t_hw))            # masked tail block if HW % t_hw != 0

    # VMEM estimate: double-buffered x/out tiles + in-kernel intermediates + weights.
    need = (2 * (Cin * t_hw * x_itemsize + Cout * t_hw * out_itemsize)
            + Cin * t_hw * (4 + mm_itemsize)
            + Cout * Cin * mm_itemsize + Cin * 2 * 4)
    vmem_cap_safe = max(vmem_cap - (8 << 20), 32 << 20)   # headroom for Mosaic scratch
    vmem_limit = int(min(max(need + (8 << 20), 32 << 20), vmem_cap_safe))

    cost = pl.CostEstimate(
        flops=2 * N * HW * Cin * Cout + 3 * N * HW * Cin,
        transcendentals=0,
        bytes_accessed=(N * HW * (Cin * x_itemsize + Cout * out_itemsize)
                        + Cout * Cin * mm_itemsize + Cin * 2 * 4),
    )

    return pl.pallas_call(
        _transition_block3_kernel,
        out_shape=jax.ShapeDtypeStruct((N, Cout, HW), out_dtype),
        grid_spec=pltpu.PrefetchScalarGridSpec(
            num_scalar_prefetch=0,
            grid=grid,
            in_specs=[
                pl.BlockSpec((1, Cin, t_hw), lambda n, t: (n, 0, t)),
                pl.BlockSpec((Cin, 2), lambda n, t: (0, 0)),      # grid-invariant
                pl.BlockSpec((Cout, Cin), lambda n, t: (0, 0)),   # grid-invariant
            ],
            out_specs=pl.BlockSpec((1, Cout, t_hw), lambda n, t: (n, 0, t)),
        ),
        compiler_params=pltpu.CompilerParams(
            dimension_semantics=("parallel", "parallel"),
            vmem_limit_bytes=vmem_limit,
        ),
        cost_estimate=cost,
    )(x3, sb, wt)


# --------------------------------------------------------------------------- public API
def transition_block3(x_nchw, gamma, beta, running_mean, running_var, weight,
                      eps=1e-5, hw_tile=None, matmul_dtype=jnp.bfloat16,
                      small_hw_threshold=256):
    """TransitionBlock3 forward (eval mode, dropRate=0).

    x_nchw: (N, Cin, H, W), f32 or bf16 (output keeps x's dtype).
    weight: (Cin, Cout) — the ConvTranspose2d(k=1, bias=False) weight squeezed to 2D.
    """
    N, Cin, H, W = x_nchw.shape
    Cout = weight.shape[1]
    HW = H * W

    # Fold eval-mode BatchNorm into a per-channel affine; pack into one small operand.
    scale = gamma / jnp.sqrt(running_var + eps)                     # (Cin,)
    bias = beta - running_mean * scale                              # (Cin,)
    sb = jnp.stack([scale, bias], axis=1).astype(jnp.float32)       # (Cin, 2)
    wt = jnp.transpose(weight).astype(matmul_dtype)                 # (Cout, Cin), pre-cast

    out_dtype = x_nchw.dtype
    x3 = x_nchw.reshape(N, Cin, HW)                                 # metadata-only reshape

    # Small-HW path: relayout once so the lane dim is N*HW (dense >=128-lane stores,
    # fewer / larger grid steps). The relayout tensors are tiny by definition here.
    small_path = (HW < small_hw_threshold) and (N > 1)
    if small_path:
        x3 = jnp.transpose(x3, (1, 0, 2)).reshape(1, Cin, N * HW)

    out3 = _fused_bn_relu_conv1x1(x3, sb, wt, out_dtype, hw_tile=hw_tile)

    if small_path:
        out3 = jnp.transpose(out3.reshape(Cout, N, HW), (1, 0, 2))  # -> (N, Cout, HW)
    return out3.reshape(N, Cout, H, W)


# --------------------------------------------------------------------------- reference + tests
def _reference(x_nchw, gamma, beta, running_mean, running_var, weight, eps=1e-5):
    x = x_nchw.astype(jnp.float32)
    scale = gamma / jnp.sqrt(running_var + eps)
    bias = beta - running_mean * scale
    y = jnp.maximum(x * scale[None, :, None, None] + bias[None, :, None, None], 0.0)
    return jnp.einsum("nihw,io->nohw", y, weight)


def _make_params(key, cin, cout):
    k_g, k_b, k_m, k_v, k_w = jax.random.split(key, 5)
    gamma = 1.0 + 0.1 * jax.random.normal(k_g, (cin,), dtype=jnp.float32)
    beta = 0.1 * jax.random.normal(k_b, (cin,), dtype=jnp.float32)
    running_mean = 0.1 * jax.random.normal(k_m, (cin,), dtype=jnp.float32)
    running_var = jnp.abs(1.0 + 0.1 * jax.random.normal(k_v, (cin,), dtype=jnp.float32))
    weight = jax.random.normal(k_w, (cin, cout), dtype=jnp.float32) * 0.1
    return gamma, beta, running_mean, running_var, weight


if __name__ == "__main__":
    key = jax.random.PRNGKey(0)
    k_x, k_p, k_x2, k_x3, k_p3 = jax.random.split(key, 5)

    # ---- Test 1: main path (N=2, Cin=4, 16x16, Cout=8) --------------------------------
    N, Cin, H, W, Cout = 2, 4, 16, 16, 8
    x = jax.random.normal(k_x, (N, Cin, H, W), dtype=jnp.float32)
    gamma, beta, rmean, rvar, weight = _make_params(k_p, Cin, Cout)
    ref = _reference(x, gamma, beta, rmean, rvar, weight)

    out_f32 = jax.block_until_ready(
        transition_block3(x, gamma, beta, rmean, rvar, weight, matmul_dtype=jnp.float32))
    assert out_f32.shape == (N, Cout, H, W)
    assert jnp.allclose(out_f32, ref, atol=1e-5, rtol=1e-5), "f32 mismatch vs reference"

    out_bf16 = jax.block_until_ready(
        transition_block3(x, gamma, beta, rmean, rvar, weight))      # default bf16 MXU path
    assert jnp.allclose(out_bf16, ref, atol=2e-2, rtol=2e-2), "bf16 mismatch vs reference"

    # bf16 streaming path: bf16 input, bf16 output (surrounding net in bf16).
    x_bf16 = x.astype(jnp.bfloat16)
    ref_bf16_in = _reference(x_bf16, gamma, beta, rmean, rvar, weight)
    out_stream = jax.block_until_ready(
        transition_block3(x_bf16, gamma, beta, rmean, rvar, weight))
    assert out_stream.dtype == jnp.bfloat16
    assert jnp.allclose(out_stream.astype(jnp.float32), ref_bf16_in, atol=5e-2, rtol=5e-2), \
        "bf16-streaming mismatch vs reference"

    # ---- Test 2: non-divisible spatial extent (masked tail block on the main path) ----
    H2, W2 = 20, 20                      # HW = 400, hw_tile=128 -> tiles 128/128/128/16
    x2 = jax.random.normal(k_x2, (N, Cin, H2, W2), dtype=jnp.float32)
    ref2 = _reference(x2, gamma, beta, rmean, rvar, weight)
    out_tail = jax.block_until_ready(
        transition_block3(x2, gamma, beta, rmean, rvar, weight,
                          hw_tile=128, matmul_dtype=jnp.float32))
    assert jnp.allclose(out_tail, ref2, atol=1e-5, rtol=1e-5), "tail-mask mismatch vs reference"

    # ---- Test 3: small-HW path (8x8 feature map, odd Cin) ------------------------------
    N3, Cin3, H3, W3, Cout3 = 2, 5, 8, 8, 3
    x3 = jax.random.normal(k_x3, (N3, Cin3, H3, W3), dtype=jnp.float32)
    gamma3, beta3, rmean3, rvar3, weight3 = _make_params(k_p3, Cin3, Cout3)
    ref3 = _reference(x3, gamma3, beta3, rmean3, rvar3, weight3)
    out_small = jax.block_until_ready(
        transition_block3(x3, gamma3, beta3, rmean3, rvar3, weight3, matmul_dtype=jnp.float32))
    assert out_small.shape == (N3, Cout3, H3, W3)
    assert jnp.allclose(out_small, ref3, atol=1e-5, rtol=1e-5), "small-HW mismatch vs reference"

    # TODO(synk): training-mode dropout (dropRate>0) is not implemented; the module's
    # default dropRate=0.0 / eval path is what this kernel covers.
    print("KERNEL_OK")
</pallas_src>

<mosaic_0001>
module attributes {stable_mosaic.version = 11 : i64} {
  func.func @_transition_block3_kernel(%arg0: i32, %arg1: i32, %arg2: memref<1x4x256xf32, #tpu.memory_space<vmem>>, %arg3: memref<4x2xf32, #tpu.memory_space<vmem>>, %arg4: memref<8x4xf32, #tpu.memory_space<vmem>>, %arg5: memref<1x8x256xf32, #tpu.memory_space<vmem>>) attributes {dimension_semantics = [#tpu.dimension_semantics<parallel>, #tpu.dimension_semantics<parallel>], iteration_bounds = array<i64: 2, 1>, scalar_prefetch = 0 : i64, scratch_operands = 0 : i64, tpu.core_type = #tpu.core_type<tc>, window_params = [{transform_indices = @transform_0, window_bounds = array<i64: 1, 4, 256>}, {pipeline_mode = #tpu.pipeline_mode<synchronous>, transform_indices = @transform_1, window_bounds = array<i64: 4, 2>}, {pipeline_mode = #tpu.pipeline_mode<synchronous>, transform_indices = @transform_2, window_bounds = array<i64: 8, 4>}, {transform_indices = @transform_3, window_bounds = array<i64: 1, 8, 256>}]} {
    %c0 = arith.constant 0 : index
    %c0_0 = arith.constant 0 : index
    %c0_1 = arith.constant 0 : index
    %0 = vector.load %arg2[%c0, %c0_0, %c0_1] : memref<1x4x256xf32, #tpu.memory_space<vmem>>, vector<1x4x256xf32>
    %1 = vector.shape_cast %0 : vector<1x4x256xf32> to vector<4x256xf32>
    %c0_2 = arith.constant 0 : index
    %c0_3 = arith.constant 0 : index
    %2 = vector.load %arg3[%c0_2, %c0_3] : memref<4x2xf32, #tpu.memory_space<vmem>>, vector<4x1xf32>
    %c0_4 = arith.constant 0 : index
    %c1 = arith.constant 1 : index
    %3 = vector.load %arg3[%c0_4, %c1] : memref<4x2xf32, #tpu.memory_space<vmem>>, vector<4x1xf32>
    %c0_5 = arith.constant 0 : index
    %c0_6 = arith.constant 0 : index
    %4 = vector.load %arg4[%c0_5, %c0_6] : memref<8x4xf32, #tpu.memory_space<vmem>>, vector<8x4xf32>
    %5 = vector.broadcast %2 : vector<4x1xf32> to vector<4x256xf32>
    %6 = arith.mulf %1, %5 : vector<4x256xf32>
    %7 = vector.broadcast %3 : vector<4x1xf32> to vector<4x256xf32>
    %8 = arith.addf %6, %7 : vector<4x256xf32>
    %cst = arith.constant 0.000000e+00 : f32
    %9 = vector.broadcast %cst : f32 to vector<4x256xf32>
    %10 = arith.maximumf %8, %9 : vector<4x256xf32>
    %cst_7 = arith.constant dense<0.000000e+00> : vector<8x256xf32>
    %11 = tpu.matmul %4, %10, %cst_7 {dimension_numbers = #tpu.dot_dimension_numbers<[1], [0], [0], [1], [0, 0, 1, 1], [], []>} : vector<8x4xf32>, vector<4x256xf32>, vector<8x256xf32> -> vector<8x256xf32>
    %c0_8 = arith.constant 0 : index
    %c0_9 = arith.constant 0 : index
    %c0_10 = arith.constant 0 : index
    %12 = vector.load %arg5[%c0_8, %c0_9, %c0_10] : memref<1x8x256xf32, #tpu.memory_space<vmem>>, vector<1x8x256xf32>
    %13 = vector.shape_cast %12 : vector<1x8x256xf32> to vector<8x256xf32>
    %14 = vector.shape_cast %11 : vector<8x256xf32> to vector<1x8x256xf32>
    tpu.vector_store %arg5[%c0_8, %c0_9, %c0_10], %14 {strides = array<i32>} : memref<1x8x256xf32, #tpu.memory_space<vmem>>, vector<1x8x256xf32>,
    return
  }
  func.func @transform_0(%arg0: i32, %arg1: i32) -> (i32, i32, i32) {
    %c0_i32 = arith.constant 0 : i32
    %c0_i32_0 = arith.constant 0 : i32
    return %arg0, %c0_i32, %arg1 : i32, i32, i32
  }
  func.func @transform_1(%arg0: i32, %arg1: i32) -> (i32, i32) {
    %c0_i32 = arith.constant 0 : i32
    %c0_i32_0 = arith.constant 0 : i32
    %c0_i32_1 = arith.constant 0 : i32
    return %c0_i32, %c0_i32_0 : i32, i32
  }
  func.func @transform_2(%arg0: i32, %arg1: i32) -> (i32, i32) {
    %c0_i32 = arith.constant 0 : i32
    %c0_i32_0 = arith.constant 0 : i32
    %c0_i32_1 = arith.constant 0 : i32
    return %c0_i32, %c0_i32_0 : i32, i32
  }
  func.func @transform_3(%arg0: i32, %arg1: i32) -> (i32, i32, i32) {
    %c0_i32 = arith.constant 0 : i32
    %c0_i32_0 = arith.constant 0 : i32
    return %arg0, %c0_i32, %arg1 : i32, i32, i32
  }
}

</mosaic_0001>

<bundles_post_ra>
// kernel: tpu_custom_call.1
= control target key start
LH: loop header
LB: loop body
LE: loop exit
PB: predicated region body
PF: predicated region fallthrough
CT: control target
= control target key end

     0   :  { %8 = vsyncpa [#allocation3], 0  ;;  %s708_s0 = inlined_call_operand.vmem [shape: f32[2,4,256], index: 0, kind: input, shape index: {}]   ;;  %s709_s1 = inlined_call_operand.vmem [shape: f32[4,2], index: 1, kind: input, shape index: {}]   ;;  %s710_s2 = inlined_call_operand.vmem [shape: f32[8,4], index: 2, kind: input, shape index: {}]   ;;  %s711_s3 = inlined_call_operand.hbm [shape: f32[2,8,256], index: 3, kind: output, shape index: {}]  }
   0x1   :  { %10 = vsyncpa [#allocation3 + $0x1], 0  ;;  %s590_s12 = smov 0   ;;  %s592_s13 = smov 0  }
   0x2   :  { %s594_s14 = smov 0   ;;  %s596_s15 = smov 0  }
   0x3   :  { %s598_s16 = smov 0   ;;  %s600_s17 = smov 0  }
   0x4 LB: > { %s406_s18 = sadd.s32 4294967295, %s563_s17   ;;  %s407_s19 = sadd.s32 4294967294, %s563_s17   ;;  %s563_s17 = sphi %s600_s17, %s16_s17   ;;  %s559_s16 = sphi %s598_s16, %s718_s16   ;;  %s555_s15 = sphi %s596_s15, %s717_s15   ;;  %s551_s14 = sphi %s594_s14, %s716_s14   ;;  %s547_s13 = sphi %s592_s13, %s715_s13   ;;  %s543_s12 = sphi %s590_s12, %s714_s12  }
   0x5   : > { %s28_s20 = sadd.s32 1, %s559_s16  ;;  %s107_s21 = sadd.s32 1, %s551_s14 }
   0x6   : > { %p30_p0 = scmp.ge.s32.totalorder %s28_s20, 2  ;;  %p117_p1 = scmp.ne.s32.totalorder %s551_s14, %s547_s13 }
   0x7   : > { %p118_p2 = scmp.eq.s32.totalorder %s406_s18, 1  ;;  %p123_p3 = scmp.ne.s32.totalorder %s547_s13, %s543_s12 }
   0x8   : > { %s720_s20 = smov (%p30_p0, %s28_s20), 0  ;;  %p124_p5 = scmp.eq.s32.totalorder %s407_s19, 1 }
   0x9   : > { %p630_p4 = por %p118_p2, %p117_p1  ;;  %s102_s23 = ssub.s32 %s559_s16, %s720_s20 }
   0xa   : > { %p410_p6 = scmp.ge.s32.totalorder %s563_s17, 1  ;;  %p105_p7 = scmp.eq.s32.totalorder %s102_s23, 0 }
   0xb   : > { %p637_p8 = por %p124_p5, %p123_p3  ;;  %p161_p9 = scmp.lt.s32.totalorder %s563_s17, 3 }
   0xc   : > { %s643_s25 = scalar_select %p105_p7, %s551_s14, %s107_s21  }
   0xd   : > { %p162_p10 = pnand %p410_p6, %p161_p9 }
   0xe   : > { %v201_v0 = vld [vmem:[%s709_s1] sm:$0xf] (!%p162_p10)  ;;  %v565_v1 = vmov (!%p162_p10), 0   ;;  %v566_v2 = vmov (!%p162_p10), 1   ;;  %v567_v3 = vmov (!%p162_p10), 0.0   ;;  %p190_p11 = scmp.lt.s32.totalorder (!%p162_p10), %s555_s15, 1  ;;  %v210_v6 = vlaneseq (!%p162_p10) }
   0xf   : > { %165 = sbr.rel (%p162_p10) target bundleno = 386 (0x182), region = 32  ;;  %483 = vset.pattern.permute.xlu0 (!%p162_p10), %v565_v1  ;;  %304 = vmatprep.mubr.f32.mxu0 (!%p162_p10), %v567_v3  ;;  %v568_v4 = vmov (!%p162_p10), 839922192   ;;  %vm235_vm0 = vcmask (!%p162_p10), 1043456   ;;  %v202_v19 = vld [vmem:[%s710_s2] sm:$0xff] (!%p162_p10)  ;;  %vm231_vm1 = vcmask (!%p162_p10), 31744  }
  0x10   : > { %205 = vperm.xlu0 (!%p162_p10), %483, %v201_v0   ;;  %v208_v5 = vunpack.c.l.s4 (!%p162_p10), %v568_v4  ;;  %v211_v8 = vshrl.u32 (!%p162_p10), %v210_v6, 7  ;;  %s186_s8 = sand.u32 (!%p162_p10), 1, %s547_s13   ;;  %s423_s18 = sshll.u32 (!%p162_p10), %s555_s15, 8 }
  0x11   : > { %s411_s9 = sshll.u32 (!%p162_p10), %s186_s8, 4  ;;  %s663_s23 = scalar_lea.hbm (!%p162_p10), %s711_s3, %s423_s18 }
  0x12   : > { %v209_v7 = vunpack.c.0.s8 (!%p162_p10), %v208_v5  ;;  %s188_s10 = scalar_lea.vmem (!%p162_p10), [#allocation2], %s411_s9  ;;  %s314_s26 = scalar_lea.sflag (!%p162_p10), [#allocation3], %s186_s8 }
  0x13   : > { %s330_s11 = sshll.u32 (!%p162_p10), %s188_s10, 4  ;;  %s658_s11 = int_to_ptr.vmem [resolvable:$true] %s330_s11 }
  0x14   : > { %484 = vset.pattern.permute.xlu0 (!%p162_p10), %v566_v2  ;;  %v212_v9 = vsub.s32 (!%p162_p10), %v209_v7, %v211_v8  ;;  %s485_s27 = scalar_lea.vmem (!%p162_p10), %s658_s11, 256 }
  0x15   : > { %217 = vperm.xlu0 (!%p162_p10), %484, %v201_v0   ;;  %p486_p12 = scmp.ne.s32.totalorder (!%p162_p10), %s658_s11, %s485_s27 }
  0x16   : > { %s191_s28 = scalar_select %p190_p11, %s555_s15, 1 }
  0x17   : > { %p487_p13 = pnand %p486_p12, %p630_p4  ;;  %s569_s15 = smov [#allocation2]  }
  0x18   : > { %s422_s29 = sshll.u32 %s191_s28, 3  ;;  %s489_s28 = sshll.u32 %s569_s15, 4  ;;  %s490_s28 = int_to_ptr.vmem [resolvable:$false] %s489_s28 }
  0x19   : > { %s197_s5 = scalar_lea.vmem %s708_s0, %s422_s29  ;;  %p488_p0 = pneg %p487_p13 }
  0x1a   : > { %v200_v12 = vld [vmem:[%s197_s5] sm:$0xff]  ;;  %s491_s29 = scalar_lea.vmem %s490_s28, 512  ;;  %p492_p1 = scmp.lt.s32.totalorder %s658_s11, %s490_s28 }
  0x1b   : > { %p493_p2 = scmp.lt.s32.totalorder %s491_s29, %s485_s27 }
  0x1d   : > { %p494_p3 = por %p493_p2, %p492_p1 }
  0x1f   : > { %p495_p5 = pnand %p494_p3, %p488_p0 }
  0x8f   : > { %v206_v10 = vpop.permute.xlu0 %205 }
  0x90   : > { %v213_v11 = vrot.slane %v206_v10, %v212_v9 }
  0x92   : > { %v215_v14 = vmul.f32 %v213_v11, %v200_v12 }
  0x94   : > { %v218_v13 = vpop.permute.xlu0 %217 }
  0x95   : > { %v225_v15 = vrot.slane %v218_v13, %v212_v9 }
  0x97   : > { %v227_v16 = vadd.f32 %v225_v15, %v215_v14 }
  0x99   : > { %v228_v17 = vmax.f32 %v227_v16, 0.0 }
  0x9b   : > { %v230_v18 = vcombine.high %v228_v17, %v228_v17 }
  0x9d   : > { %414 = vmatprep.subr.msk.mxu0 %vm235_vm0, %v230_v18 }
  0x9e   : > { %415 = vmatpush1.msk.msra.mxu0 %vm235_vm0, %v228_v17 }
  0x9f   : > { %416 = vmatmul.mubr.msk.f32.vlgmr.msra.gmra.mrb[0].mxu0 %vm231_vm1, %v202_v19 }
 0x172   : > { %v306_v20 = vpop.f32.mrb[0].mxu0 }
 0x173   : > { %311 = vst [vmem:[%s188_s10] sm:$0xff] %v306_v20  ;;  %v308_v21 = vpop.f32.mrb[1].mxu0 }
 0x174   : > { %312 = vst [vmem:[%s188_s10 + $0x8] sm:$0xff] %v308_v21 }
 0x175   : > { %498 = shalt.err (!%p495_p5)
}
 0x176   : > { %s499_s30 = scalar_lea.hbm %s663_s23, 256  ;;  %s503_s6 = scalar_lea.hbm %s711_s3, 512 }
 0x177   : > { %p500_p6 = scmp.ne.s32.totalorder %s663_s23, %s499_s30  ;;  %p504_p10 = scmp.lt.u32.totalorder %s663_s23, %s711_s3 }
 0x178   : > { %p505_p11 = scmp.lt.u32.totalorder %s503_s6, %s499_s30  ;;  %p507_p13 = scmp.lt.u32.totalorder %s499_s30, %s663_s23 }
 0x179   : > { %p501_p7 = pnand %p500_p6, %p630_p4 }
 0x17a   : > { %p506_p12 = por %p505_p11, %p504_p10 }
 0x17b   : > { %p502_p9 = pneg %p501_p7 }
 0x17c   : > { %p508_p0 = por %p507_p13, %p506_p12 }
 0x17e   : > { %p509_p1 = pnand %p508_p0, %p502_p9 }
 0x180   : > { %512 = shalt.err (!%p509_p1)
}
 0x181   : > { %424 = dma.vmem_to_hbm [thread:$0]  (%p630_p4), %s658_s11, 256, %s663_s23, %s314_s26  }
 0x182 PF: > { %p430_p2 = scmp.ge.s32.totalorder %s563_s17, 2  ;;  %s342_s9 = sand.u32 1, %s543_s12  }
 0x183   : > { %s343_s10 = scalar_lea.sflag [#allocation3], %s342_s9 }
 0x184   : > { %p427_p3 = pnand %p430_p2, %p637_p8 }
 0x186   : > { %538 = dma.done.wait (!%p427_p3), %s343_s10, 256  }
 0x187   : > { %540 = vsyncadd (!%p427_p3), %s343_s10, 4294967040  ;;  %s16_s17 = sadd.s32 1, %s563_s17   ;;  %s714_s12 = smov %s547_s13 }
 0x188   : > { %p13_p5 = scmp.ge.s32.totalorder %s16_s17, 4   ;;  %s715_s13 = smov %s551_s14 }
 0x189   : > { %s716_s14 = smov %s643_s25  ;;  %s717_s15 = smov %s559_s16 }
 0x18a   : > { %s718_s16 = smov %s720_s20  ;;  %15 = sbr.rel (!%p13_p5) target bundleno = 4 (0x4), region = 67 }
 0x191   :  { %348 = vsyncpa [#allocation3], 1 }
 0x192   :  { %350 = vsyncpa [#allocation3 + $0x1], 1 }

</bundles_post_ra>
